<compile_context>
chip_gen: v6e
topology: v6e:2x2x1
jax: 0.10.0
libtpu: 0.0.40
codegen_flags: <defaults>
</compile_context>

<pallas_src>
import jax
import jax.numpy as jnp
from jax.experimental import pallas as pl
from jax.experimental.pallas import tpu as pltpu


def _bahdanau_kernel(add_ref, w2_ref, hh_in_ref, att_ref, c_ref, alpha_ref):
    tb, S, V = hh_in_ref.shape

    # --- streamed score part on the MXU:  base[b,1,s] = <hh_in[b,s,:], w2> ----
    # Streamed dtype in, f32 accumulation out.  No f32 upcast of the [tb,S,V]
    # tile, no per-element VALU mul / XLU lane reduce.
    w2_b = jnp.broadcast_to(w2_ref[...], (tb, 1, V))            # [tb, 1, V]
    base = jnp.einsum('bqv,bsv->bqs', w2_b, hh_in_ref[...],
                      preferred_element_type=jnp.float32)       # [tb, 1, S] f32
    # add_ref already holds coef * mask * <dhs, w1_t @ w2> (host precomputed).
    scores = base + add_ref[...]                                # [tb, 1, S] f32

    # --- torch.sparse.softmax over dim=1 --------------------------------------
    # .to_sparse() drops exactly-zero entries, so score==0 slots are EXCLUDED.
    # Non-present slots stay exactly zero (all-zero hh_in row -> MXU dot == 0,
    # additive term == 0), so the exclusion semantics hold.
    active = scores != 0.0
    masked = jnp.where(active, scores, jnp.float32(-1e30))
    m = jnp.max(masked, axis=-1, keepdims=True)                 # [tb, 1, 1]
    e = jnp.where(active, jnp.exp(masked - m), 0.0)             # [tb, 1, S]
    denom = jnp.sum(e, axis=-1, keepdims=True)                  # [tb, 1, 1]
    inv = pl.reciprocal(denom)                                  # exact: rows sum to 1
    alpha = jnp.where(denom > 0.0, e * inv, 0.0)                # [tb, 1, S] f32

    # --- c_bahadanau = sparse.sum(Attender * alpha, dim=1) on the MXU ---------
    # Second flash-style batched einsum: streamed-dtype inputs, f32 accumulate.
    # No [tb,S,D] f32 broadcast temp and no alpha relayout.
    att = att_ref[...]                                          # [tb, S, D]
    c_ref[...] = jnp.einsum('bqs,bsd->bqd', alpha.astype(att.dtype), att,
                            preferred_element_type=jnp.float32)  # [tb, 1, D]
    alpha_ref[...] = alpha                                      # lane-dense over S


def _vmem_budgets():
    """(tile_picker_budget_bytes, vmem_limit_bytes), generation aware."""
    try:
        cap = pltpu.get_tpu_info().vmem_capacity_bytes
    except Exception:                      # interpret mode / older jax: be conservative
        cap = 64 * 1024 * 1024
    if cap >= 100 * 1024 * 1024:           # v5e / v6e: 128 MiB VMEM
        return 44 * 1024 * 1024, 96 * 1024 * 1024
    return 20 * 1024 * 1024, 48 * 1024 * 1024   # v7x: 64 MiB per TensorCore


def _pick_batch_tile(B, S, V, D, stream_itemsize, budget_bytes,
                     stream_buffers=2, min_steps=4):
    """Largest divisor of B whose per-step VMEM footprint fits the budget while
    keeping at least `min_steps` grid steps (>=2 pipelined steps per TensorCore
    on v7x); falls back to maximizing the number of steps with >=8 rows/step."""
    per_row = (stream_buffers * S * (V + D) * stream_itemsize   # pipelined streams
               + V * stream_itemsize                            # w2 broadcast in kernel
               + 2 * (D + 2 * S) * 4                            # c/alpha out + add term bufs
               + 8 * S * 4)                                     # f32 softmax temporaries
    cap = max(1, budget_bytes // max(per_row, 1))
    viable = [t for t in range(1, min(B, cap) + 1) if B % t == 0]
    if not viable:
        # TODO(synk): add an S-chunked ("arbitrary") grid axis with an online
        # softmax + c accumulator for shapes where even a 1-row tile overflows.
        return 1
    preferred = [t for t in viable if (B // t) >= min_steps and t >= 8]
    if preferred:
        return max(preferred)          # biggest tile that still gives >= min_steps
    fallback = [t for t in viable if t >= 8] or viable
    return min(fallback)               # maximize steps subject to >= 8 rows/step


def bahdanau_attention(decoder_hidden_state, batch_decoder_input_hh,
                       batch_decoder_input_attender, sparse_indices, sparse_val,
                       w1_t, w2, *, batch_tile=None, stream_buffers=2):
    """Forward pass of Bahadanau_Attention.

    The two dominant [B,S,*] tensors are streamed in whatever dtype the caller
    supplies (bf16 recommended from the producer) -- no pad / cast pre-pass.
    Returns (c_bahadanau [B,D] f32, alpha [B,S,1] f32)."""
    B, H = decoder_hidden_state.shape
    _, S, V = batch_decoder_input_hh.shape
    D = batch_decoder_input_attender.shape[-1]

    # --- tiny host-side precompute: O(B*S), negligible vs the B*S*(V+D) streams
    mask = jnp.zeros((B, S), jnp.float32).at[
        sparse_indices[0], sparse_indices[1]].set(1.0)
    coef = 1.0 if sparse_val == 1 else 2.0            # static, same as PyTorch `if`
    w12 = w1_t.astype(jnp.float32) @ w2[0].astype(jnp.float32)       # [H]
    hh_score = decoder_hidden_state.astype(jnp.float32) @ w12        # [B]
    add_term = ((coef * hh_score)[:, None] * mask)[:, None, :]       # [B, 1, S] f32

    hh_in = batch_decoder_input_hh                    # streamed as-is (no pre-pass)
    att = batch_decoder_input_attender                # streamed as-is
    w2_3 = w2.reshape(1, 1, V).astype(hh_in.dtype)    # MXU RHS, matches stream dtype

    picker_budget, vmem_limit = _vmem_budgets()
    if batch_tile is None:
        batch_tile = _pick_batch_tile(B, S, V, D, hh_in.dtype.itemsize,
                                      picker_budget, stream_buffers)
    tb = int(batch_tile)
    if B % tb != 0:
        raise ValueError(f"batch_tile={tb} must evenly divide B={B}")
    nb = B // tb

    def _stream_spec(shape, index_map):
        # Optional deeper pipelining for the two streamed inputs (sweep knob).
        if stream_buffers > 2:
            return pl.BlockSpec(shape, index_map,
                                pipeline_mode=pl.Buffered(stream_buffers))
        return pl.BlockSpec(shape, index_map)

    c3, alpha3 = pl.pallas_call(
        _bahdanau_kernel,
        out_shape=(
            jax.ShapeDtypeStruct((B, 1, D), jnp.float32),
            jax.ShapeDtypeStruct((B, 1, S), jnp.float32),
        ),
        grid=(nb,),
        in_specs=[
            pl.BlockSpec((tb, 1, S), lambda i: (i, 0, 0)),     # coef*mask*<dhs,w1w2>
            pl.BlockSpec((1, 1, V), lambda i: (0, 0, 0)),      # w2 (constant block)
            _stream_spec((tb, S, V), lambda i: (i, 0, 0)),     # Batch_decoder_input_hh
            _stream_spec((tb, S, D), lambda i: (i, 0, 0)),     # Attender
        ],
        out_specs=(
            pl.BlockSpec((tb, 1, D), lambda i: (i, 0, 0)),
            pl.BlockSpec((tb, 1, S), lambda i: (i, 0, 0)),
        ),
        compiler_params=pltpu.CompilerParams(
            dimension_semantics=("parallel",),   # batch tiles shard across TCs on v7x
            vmem_limit_bytes=vmem_limit,         # generation-aware budget
        ),
    )(add_term, w2_3, hh_in, att)

    c = c3[:, 0, :]                                   # [B, D]
    alpha = jnp.transpose(alpha3, (0, 2, 1))          # [B, S, 1], host-side (tiny)
    return c, alpha


if __name__ == "__main__":
    # Small shapes, lane-dense feature dims (V = D = 128), B large enough that
    # the tile picker produces a >=4-step pipelined grid (>=2 steps/TC on v7x).
    B, S, H, V, D = 32, 8, 32, 128, 128
    key = jax.random.PRNGKey(0)
    k1, k2, k3, k4, k5 = jax.random.split(key, 5)

    decoder_hidden_state = jax.random.normal(k1, (B, H), jnp.float32)
    # Producer-side bf16 for the two dominant tensors: streamed directly into
    # the kernel, no wrapper pad/cast pre-pass.
    attender = jax.random.normal(k2, (B, S, D), jnp.float32).astype(jnp.bfloat16)

    # deterministic "Linear" parameters (bias=False in the module)
    w1_t = 0.1 * jax.random.normal(k3, (H, V), jnp.float32)   # Linear(H, V).weight.T
    w2 = 0.1 * jax.random.normal(k4, (1, V), jnp.float32)     # Linear(V, 1).weight

    # sparse structure: 3 "present" (batch, seq) slots per sentence
    bi = jnp.repeat(jnp.arange(B, dtype=jnp.int32), 3)
    si = (jnp.arange(3 * B, dtype=jnp.int32) * 5 + 1) % S
    sparse_indices = jnp.stack([bi, si])
    mask = jnp.zeros((B, S), jnp.float32).at[
        sparse_indices[0], sparse_indices[1]].set(1.0)
    # Batch_decoder_input_hh is only populated on the sparse slots
    batch_decoder_input_hh = (
        jax.random.normal(k5, (B, S, V), jnp.float32) * mask[:, :, None]
    ).astype(jnp.bfloat16)

    sparse_val = 0
    c, alpha = bahdanau_attention(decoder_hidden_state, batch_decoder_input_hh,
                                  attender, sparse_indices, sparse_val, w1_t, w2)
    jax.block_until_ready((c, alpha))

    # pure-JAX dense reference of the ORIGINAL (un-fused) formulation, evaluated
    # on the same bf16 values the kernel streams (weights kept in f32).
    hh_in_f = batch_decoder_input_hh.astype(jnp.float32)
    att_f = attender.astype(jnp.float32)
    hh = decoder_hidden_state @ w1_t
    sparse_part = mask[:, :, None] * hh[:, None, :]
    coef = 1.0 if sparse_val == 1 else 2.0
    sum_val = hh_in_f + coef * sparse_part
    scores = jnp.sum(sum_val * w2[0][None, None, :], axis=-1)
    active = scores != 0.0
    msc = jnp.where(active, scores, -1e30)
    m = jnp.max(msc, axis=1, keepdims=True)
    e = jnp.where(active, jnp.exp(msc - m), 0.0)
    den = jnp.sum(e, axis=1, keepdims=True)
    alpha_ref = jnp.where(den > 0.0, e / den, 0.0)
    c_ref = jnp.sum(alpha_ref[:, :, None] * att_f, axis=1)

    # Tolerances cover the bf16 MXU contractions (f32 accumulation) vs the f32
    # reference that keeps w2 / alpha in full precision.
    assert jnp.allclose(alpha[..., 0], alpha_ref, atol=1e-2), "alpha mismatch"
    assert jnp.allclose(c, c_ref, atol=5e-2), "c_bahadanau mismatch"
    print("KERNEL_OK")
</pallas_src>

<mosaic_0001>
module attributes {stable_mosaic.version = 11 : i64} {
  func.func @_bahdanau_kernel(%arg0: i32, %arg1: memref<8x1x8xf32, #tpu.memory_space<vmem>>, %arg2: memref<1x1x128xbf16, #tpu.memory_space<vmem>>, %arg3: memref<8x8x128xbf16, #tpu.memory_space<vmem>>, %arg4: memref<8x8x128xbf16, #tpu.memory_space<vmem>>, %arg5: memref<8x1x128xf32, #tpu.memory_space<vmem>>, %arg6: memref<8x1x8xf32, #tpu.memory_space<vmem>>) attributes {dimension_semantics = [#tpu.dimension_semantics<parallel>], iteration_bounds = array<i64: 4>, scalar_prefetch = 0 : i64, scratch_operands = 0 : i64, tpu.core_type = #tpu.core_type<tc>, window_params = [{transform_indices = @transform_0, window_bounds = array<i64: 8, 1, 8>}, {pipeline_mode = #tpu.pipeline_mode<synchronous>, transform_indices = @transform_1, window_bounds = array<i64: 1, 1, 128>}, {transform_indices = @transform_2, window_bounds = array<i64: 8, 8, 128>}, {transform_indices = @transform_3, window_bounds = array<i64: 8, 8, 128>}, {transform_indices = @transform_4, window_bounds = array<i64: 8, 1, 128>}, {transform_indices = @transform_5, window_bounds = array<i64: 8, 1, 8>}]} {
    %c0 = arith.constant 0 : index
    %c0_0 = arith.constant 0 : index
    %c0_1 = arith.constant 0 : index
    %0 = vector.load %arg2[%c0, %c0_0, %c0_1] : memref<1x1x128xbf16, #tpu.memory_space<vmem>>, vector<1x1x128xbf16>
    %1 = vector.shape_cast %0 : vector<1x1x128xbf16> to vector<1x1x128xbf16>
    %2 = vector.broadcast %1 : vector<1x1x128xbf16> to vector<8x1x128xbf16>
    %c0_2 = arith.constant 0 : index
    %c0_3 = arith.constant 0 : index
    %c0_4 = arith.constant 0 : index
    %3 = vector.load %arg3[%c0_2, %c0_3, %c0_4] : memref<8x8x128xbf16, #tpu.memory_space<vmem>>, vector<8x8x128xbf16>
    "tpu.trace_start"() <{level = 10 : i32, message = "bqv,bsv->bqs"}> : () -> ()
    %cst = arith.constant dense<0.000000e+00> : vector<8x1x8xf32>
    %4 = tpu.matmul %2, %3, %cst {dimension_numbers = #tpu.dot_dimension_numbers<[2], [2], [1], [1], [0, 0, 0, 1, 1, 1], [0], [0]>} : vector<8x1x128xbf16>, vector<8x8x128xbf16>, vector<8x1x8xf32> -> vector<8x1x8xf32>
    "tpu.trace_stop"() : () -> ()
    %c0_5 = arith.constant 0 : index
    %c0_6 = arith.constant 0 : index
    %c0_7 = arith.constant 0 : index
    %5 = vector.load %arg1[%c0_5, %c0_6, %c0_7] : memref<8x1x8xf32, #tpu.memory_space<vmem>>, vector<8x1x8xf32>
    %6 = arith.addf %4, %5 : vector<8x1x8xf32>
    %cst_8 = arith.constant 0.000000e+00 : f32
    %7 = vector.broadcast %cst_8 : f32 to vector<8x1x8xf32>
    %8 = arith.cmpf one, %6, %7 : vector<8x1x8xf32>
    %cst_9 = arith.constant -1.000000e+30 : f32
    %9 = vector.broadcast %cst_9 : f32 to vector<8x1x8xf32>
    %10 = arith.select %8, %6, %9 : vector<8x1x8xi1>, vector<8x1x8xf32>
    %cst_10 = arith.constant dense<0xFF800000> : vector<8x1xf32>
    %11 = vector.multi_reduction <maximumf>, %10, %cst_10 [2] : vector<8x1x8xf32> to vector<8x1xf32>
    %12 = vector.shape_cast %11 : vector<8x1xf32> to vector<8x1x1xf32>
    %13 = vector.broadcast %12 : vector<8x1x1xf32> to vector<8x1x8xf32>
    %14 = arith.subf %10, %13 : vector<8x1x8xf32>
    %15 = math.exp %14 : vector<8x1x8xf32>
    %cst_11 = arith.constant 0.000000e+00 : f32
    %16 = vector.broadcast %cst_11 : f32 to vector<8x1x8xf32>
    %17 = arith.select %8, %15, %16 : vector<8x1x8xi1>, vector<8x1x8xf32>
    %cst_12 = arith.constant dense<0.000000e+00> : vector<8x1xf32>
    %18 = vector.multi_reduction <add>, %17, %cst_12 [2] : vector<8x1x8xf32> to vector<8x1xf32>
    %19 = vector.shape_cast %18 : vector<8x1xf32> to vector<8x1x1xf32>
    %20 = tpu.reciprocal %19 : vector<8x1x1xf32> -> vector<8x1x1xf32>
    %cst_13 = arith.constant 0.000000e+00 : f32
    %21 = vector.broadcast %cst_13 : f32 to vector<8x1x1xf32>
    %22 = arith.cmpf ogt, %19, %21 : vector<8x1x1xf32>
    %23 = vector.broadcast %20 : vector<8x1x1xf32> to vector<8x1x8xf32>
    %24 = arith.mulf %17, %23 : vector<8x1x8xf32>
    %cst_14 = arith.constant 0.000000e+00 : f32
    %25 = vector.shape_cast %22 : vector<8x1x1xi1> to vector<8x1x1xi1>
    %26 = vector.broadcast %25 : vector<8x1x1xi1> to vector<8x1x8xi1>
    %27 = vector.broadcast %cst_14 : f32 to vector<8x1x8xf32>
    %28 = arith.select %26, %24, %27 : vector<8x1x8xi1>, vector<8x1x8xf32>
    %c0_15 = arith.constant 0 : index
    %c0_16 = arith.constant 0 : index
    %c0_17 = arith.constant 0 : index
    %29 = vector.load %arg4[%c0_15, %c0_16, %c0_17] : memref<8x8x128xbf16, #tpu.memory_space<vmem>>, vector<8x8x128xbf16>
    %30 = arith.truncf %28 : vector<8x1x8xf32> to vector<8x1x8xbf16>
    "tpu.trace_start"() <{level = 10 : i32, message = "bqs,bsd->bqd"}> : () -> ()
    %cst_18 = arith.constant dense<0.000000e+00> : vector<8x1x128xf32>
    %31 = tpu.matmul %30, %29, %cst_18 {dimension_numbers = #tpu.dot_dimension_numbers<[2], [1], [1], [2], [0, 0, 0, 1, 1, 2], [0], [0]>} : vector<8x1x8xbf16>, vector<8x8x128xbf16>, vector<8x1x128xf32> -> vector<8x1x128xf32>
    "tpu.trace_stop"() : () -> ()
    %c0_19 = arith.constant 0 : index
    %c0_20 = arith.constant 0 : index
    %c0_21 = arith.constant 0 : index
    %32 = vector.load %arg5[%c0_19, %c0_20, %c0_21] : memref<8x1x128xf32, #tpu.memory_space<vmem>>, vector<8x1x128xf32>
    tpu.vector_store %arg5[%c0_19, %c0_20, %c0_21], %31 {strides = array<i32>} : memref<8x1x128xf32, #tpu.memory_space<vmem>>, vector<8x1x128xf32>,
    %c0_22 = arith.constant 0 : index
    %c0_23 = arith.constant 0 : index
    %c0_24 = arith.constant 0 : index
    %33 = vector.load %arg6[%c0_22, %c0_23, %c0_24] : memref<8x1x8xf32, #tpu.memory_space<vmem>>, vector<8x1x8xf32>
    tpu.vector_store %arg6[%c0_22, %c0_23, %c0_24], %28 {strides = array<i32>} : memref<8x1x8xf32, #tpu.memory_space<vmem>>, vector<8x1x8xf32>,
    return
  }
  func.func @transform_0(%arg0: i32) -> (i32, i32, i32) {
    %c0_i32 = arith.constant 0 : i32
    %c0_i32_0 = arith.constant 0 : i32
    %c0_i32_1 = arith.constant 0 : i32
    return %arg0, %c0_i32, %c0_i32_0 : i32, i32, i32
  }
  func.func @transform_1(%arg0: i32) -> (i32, i32, i32) {
    %c0_i32 = arith.constant 0 : i32
    %c0_i32_0 = arith.constant 0 : i32
    %c0_i32_1 = arith.constant 0 : i32
    %c0_i32_2 = arith.constant 0 : i32
    return %c0_i32, %c0_i32_0, %c0_i32_1 : i32, i32, i32
  }
  func.func @transform_2(%arg0: i32) -> (i32, i32, i32) {
    %c0_i32 = arith.constant 0 : i32
    %c0_i32_0 = arith.constant 0 : i32
    %c0_i32_1 = arith.constant 0 : i32
    return %arg0, %c0_i32, %c0_i32_0 : i32, i32, i32
  }
  func.func @transform_3(%arg0: i32) -> (i32, i32, i32) {
    %c0_i32 = arith.constant 0 : i32
    %c0_i32_0 = arith.constant 0 : i32
    %c0_i32_1 = arith.constant 0 : i32
    return %arg0, %c0_i32, %c0_i32_0 : i32, i32, i32
  }
  func.func @transform_4(%arg0: i32) -> (i32, i32, i32) {
    %c0_i32 = arith.constant 0 : i32
    %c0_i32_0 = arith.constant 0 : i32
    %c0_i32_1 = arith.constant 0 : i32
    return %arg0, %c0_i32, %c0_i32_0 : i32, i32, i32
  }
  func.func @transform_5(%arg0: i32) -> (i32, i32, i32) {
    %c0_i32 = arith.constant 0 : i32
    %c0_i32_0 = arith.constant 0 : i32
    %c0_i32_1 = arith.constant 0 : i32
    return %arg0, %c0_i32, %c0_i32_0 : i32, i32, i32
  }
}

</mosaic_0001>

<bundles_post_ra>
// kernel: tpu_custom_call.1
= control target key start
LH: loop header
LB: loop body
LE: loop exit
PB: predicated region body
PF: predicated region fallthrough
CT: control target
= control target key end

     0   :  { %11 = vsyncpa [#allocation3], 0  ;;  %s2232_s0 = inlined_call_operand.vmem [shape: f32[32,1,8], index: 0, kind: input, shape index: {}]   ;;  %s2233_s1 = inlined_call_operand.vmem [shape: bf16[1,1,128], index: 1, kind: input, shape index: {}]   ;;  %s2234_s2 = inlined_call_operand.hbm [shape: bf16[32,8,128], index: 2, kind: input, shape index: {}]   ;;  %s2235_s3 = inlined_call_operand.hbm [shape: bf16[32,8,128], index: 3, kind: input, shape index: {}]   ;;  %s2236_s4 = inlined_call_operand.hbm [shape: f32[32,1,128], index: 4, kind: output, shape index: {0}]   ;;  %s2237_s5 = inlined_call_operand.vmem [shape: f32[32,1,8], index: 5, kind: output, shape index: {1}]  }
   0x1   :  { %13 = vsyncpa [#allocation3 + $0x1], 0 }
   0x2   :  { %14 = vsyncpa [#allocation6], 0 }
   0x3   :  { %16 = vsyncpa [#allocation6 + $0x1], 0 }
   0x4   :  { %17 = vsyncpa [#allocation4], 0 }
   0x5   :  { %19 = vsyncpa [#allocation4 + $0x1], 0  ;;  %s1762_s18 = smov 0   ;;  %s1764_s19 = smov 0  }
   0x6   :  { %s1766_s20 = smov 0   ;;  %s1768_s21 = smov 0  }
   0x7 LB: > { %s1783_s22 = sadd.s32 4294967295, %s1721_s21   ;;  %s1349_s23 = sadd.s32 4294967294, %s1721_s21   ;;  %s1721_s21 = sphi %s1768_s21, %s2254_s21   ;;  %s1717_s20 = sphi %s1766_s20, %s2253_s20   ;;  %s1713_s19 = sphi %s1764_s19, %s2252_s19   ;;  %s1709_s18 = sphi %s1762_s18, %s2251_s18  }
   0x8   : > { %s1787_s24 = sadd.s32 1, %s1721_s21   ;;  %s79_s25 = sadd.s32 1, %s1717_s20 }
   0x9   : > { %s76_s26 = ssub.s32 %s1721_s21, %s1787_s24  ;;  %p86_p0 = scmp.ne.s32.totalorder %s1717_s20, %s1713_s19 }
   0xa   : > { %p77_p1 = scmp.eq.s32.totalorder %s76_s26, 0  ;;  %p87_p2 = scmp.eq.s32.totalorder %s1721_s21, 0 }
   0xb   : > { %p92_p3 = scmp.ne.s32.totalorder %s1713_s19, %s1709_s18  ;;  %p93_p4 = scmp.eq.s32.totalorder %s1783_s22, 0 }
   0xc   : > { %s1799_s27 = scalar_select %p77_p1, %s1717_s20, %s79_s25  }
   0xd   : > { %p1801_p5 = por %p87_p2, %p86_p0  ;;  %p1805_p6 = por %p93_p4, %p92_p3 }
   0xe   : > { %p142_p7 = scmp.eq.s32.totalorder %s1783_s22, 3  ;;  %p148_p8 = scmp.eq.s32.totalorder %s1349_s23, 3 }
   0xf   : > { %s2242_s29 = scalar_select %p1805_p6, 1, 0 }
  0x10   : > { %p1525_p9 = scmp.lt.s32.totalorder %s1721_s21, 4  ;;  %p1811_p10 = por %p142_p7, %p86_p0 }
  0x11   : > { %p1815_p11 = por %p148_p8, %p92_p3  ;;  %s1820_s7 = sand.u32 1, %s1717_s20  }
  0x12   : > { %s2243_s30 = scalar_select %p1811_p10, 1, 0 }
  0x13   : > { %s2244_s6 = scalar_select %p1815_p11, 1, 0 }
  0x14   : > { %s1377_s8 = sshll.u32 %s1721_s21, 9  ;;  %s1352_s9 = sshll.u32 %s1820_s7, 5 }
  0x15   : > { %s1829_s12 = scalar_lea.hbm %s2234_s2, %s1377_s8  ;;  %s209_s13 = scalar_lea.vmem [#allocation2], %s1352_s9 }
  0x16   : > { %s216_s14 = sshll.u32 %s209_s13, 4  ;;  %p1835_p12 = pnand %p1525_p9, %p1801_p5  ;;  %s1839_s14 = int_to_ptr.vmem [resolvable:$true] %s216_s14 }
  0x17   : > { %s206_s16 = scalar_lea.sflag [#allocation3], %s1820_s7  ;;  %s1597_s17 = scalar_lea.hbm %s1829_s12, 512 }
  0x18   : > { %p1598_p13 = scmp.ne.s32.totalorder %s1829_s12, %s1597_s17  ;;  %p1599_p0 = pneg %p1835_p12 }
  0x19   : > { %s1602_s26 = scalar_lea.hbm %s2234_s2, 2048  ;;  %p1603_p3 = scmp.lt.s32.totalorder %s1829_s12, %s2234_s2 }
  0x1a   : > { %p1600_p1 = pnand %p1599_p0, %p1598_p13  ;;  %p1604_p4 = scmp.lt.s32.totalorder %s1602_s26, %s1597_s17 }
  0x1c   : > { %p1601_p2 = pneg %p1600_p1  ;;  %p1605_p5 = por %p1604_p4, %p1603_p3 }
  0x1e   : > { %p1606_p7 = pnand %p1605_p5, %p1601_p2 }
  0x20   : > { %1609 = shalt.err (!%p1606_p7)
}
  0x21   : > { %s1610_s11 = scalar_lea.vmem %s1839_s14, 512  ;;  %s1723_s13 = smov [#allocation2]  }
  0x22   : > { %p1611_p8 = scmp.ne.s32.totalorder %s1839_s14, %s1610_s11  ;;  %s1615_s23 = sshll.u32 %s1723_s13, 4  ;;  %s1616_s23 = int_to_ptr.vmem [resolvable:$false] %s1615_s23 }
  0x23   : > { %s1617_s25 = scalar_lea.vmem %s1616_s23, 1024  ;;  %p1618_p1 = scmp.lt.s32.totalorder %s1839_s14, %s1616_s23 }
  0x24   : > { %p1613_p9 = pnand %p1611_p8, %p1599_p0  ;;  %p1619_p11 = scmp.lt.s32.totalorder %s1617_s25, %s1610_s11 }
  0x26   : > { %p1614_p13 = pneg %p1613_p9  ;;  %p1620_p10 = por %p1619_p11, %p1618_p1 }
  0x28   : > { %p1621_p3 = pnand %p1620_p10, %p1614_p13 }
  0x2a   : > { %1624 = shalt.err (!%p1621_p3)
}
  0x2b   : > { %s2239_s17 = smov 64   ;;  %s1725_s26 = smov 4  }
  0x2c   : > { %1517 = dma.hbm_to_vmem [thread:$0]  (!%p1835_p12), %s1829_s12, 512, %s1839_s14, %s206_s16, %s2239_s17, %s2239_s17, %s1725_s26  }
  0x2d   : > { %p1358_p10 = scmp.ge.s32.totalorder %s1721_s21, 1  ;;  %p245_p11 = scmp.lt.s32.totalorder %s1721_s21, 5 }
  0x2e   : > { %s1882_s13 = scalar_lea.hbm %s2235_s3, %s1377_s8  ;;  %s230_s23 = scalar_lea.vmem [#allocation5], %s1352_s9 }
  0x2f   : > { %p1873_p2 = pnand %p1358_p10, %p245_p11  ;;  %s237_s25 = sshll.u32 %s230_s23, 4  ;;  %s1886_s25 = int_to_ptr.vmem [resolvable:$true] %s237_s25 }
  0x30   : > { %s227_s12 = scalar_lea.sflag [#allocation6], %s1820_s7  ;;  %s1625_s14 = scalar_lea.hbm %s1882_s13, 512 }
  0x31   : > { %p1626_p4 = scmp.ne.s32.totalorder %s1882_s13, %s1625_s14  ;;  %s1630_s8 = scalar_lea.hbm %s2235_s3, 2048 }
  0x32   : > { %p1631_p8 = scmp.lt.s32.totalorder %s1882_s13, %s2235_s3  ;;  %p1632_p9 = scmp.lt.s32.totalorder %s1630_s8, %s1625_s14 }
  0x33   : > { %p1628_p5 = pnand %p1626_p4, %p1599_p0 }
  0x34   : > { %p1633_p13 = por %p1632_p9, %p1631_p8 }
  0x35   : > { %p1629_p7 = pneg %p1628_p5 }
  0x37   : > { %p1634_p1 = pnand %p1633_p13, %p1629_p7 }
  0x39   : > { %1637 = shalt.err (!%p1634_p1)
}
  0x3a   : > { %s1638_s7 = scalar_lea.vmem %s1886_s25, 512  ;;  %s1726_s9 = smov [#allocation5]  }
  0x3b   : > { %p1639_p3 = scmp.ne.s32.totalorder %s1886_s25, %s1638_s7  ;;  %s1643_s17 = sshll.u32 %s1726_s9, 4  ;;  %s1644_s17 = int_to_ptr.vmem [resolvable:$false] %s1643_s17 }
  0x3c   : > { %s1645_s23 = scalar_lea.vmem %s1644_s17, 1024  ;;  %p1646_p4 = scmp.lt.s32.totalorder %s1886_s25, %s1644_s17 }
  0x3d   : > { %p1641_p10 = pnand %p1639_p3, %p1599_p0  ;;  %p1647_p5 = scmp.lt.s32.totalorder %s1645_s23, %s1638_s7 }
  0x3f   : > { %p1642_p11 = pneg %p1641_p10  ;;  %p1648_p6 = por %p1647_p5, %p1646_p4 }
  0x41   : > { %p1649_p8 = pnand %p1648_p6, %p1642_p11 }
  0x43   : > { %1652 = shalt.err (!%p1649_p8)
}
  0x44   : > { %s2247_s14 = smov 64   ;;  %249 = sbr.rel (%p1873_p2) target bundleno = 836 (0x344), region = 36 }
  0x45   : > { %1520 = dma.hbm_to_vmem [thread:$0]  (!%p1835_p12), %s1882_s13, 512, %s1886_s25, %s227_s12, %s2247_s14, %s2247_s14, %s1725_s26  }
  0x46   : > { %s1917_s16 = sand.u32 (!%p1873_p2), 1, %s1713_s19   ;;  %p2248_p6 = scmp.ne.s32.totalorder (!%p1873_p2), %s2242_s29, 0 }
  0x47   : > { %s1359_s8 = sshll.u32 (!%p1873_p2), %s1917_s16, 5  ;;  %s252_s10 = scalar_lea.sflag (!%p1873_p2), [#allocation3], %s1917_s16 }
  0x48   : > { %s1921_s11 = scalar_lea.vmem (!%p1873_p2), [#allocation2], %s1359_s8 }
  0x49   : > { %1696 = dma.done.wait (%p2248_p6), %s252_s10, 512  }
  0x4a   : > { %1698 = vsyncadd (%p2248_p6), %s252_s10, 4294966784  ;;  %s261_s15 = scalar_lea.sflag [#allocation6], %s1917_s16  ;;  %s1928_s26 = scalar_lea.vmem [#allocation5], %s1359_s8 }
  0x4b   : > { %1700 = dma.done.wait (%p2248_p6), %s261_s15, 512  }
  0x4c   : > { %1702 = vsyncadd (%p2248_p6), %s261_s15, 4294966784  ;;  %v1727_v0 = vmov 0.0   ;;  %vm1728_vm0 = vmmov 0   ;;  %v319_v1 = vld [vmem:[%s1921_s11] sm:$0xf]  ;;  %s1362_s13 = sshll.u32 %s1783_s22, 3 }
  0x4d   : > { %1412 = vmatprep.subr.bf16.mxu0 %v1727_v0  ;;  %1418 = vmatprep.subr.bf16.mxu1 %v1727_v0  ;;  %v320_v2 = vld [vmem:[%s1921_s11 + $0x4] sm:$0xf]  ;;  %v318_v3 = vld [vmem:[%s2233_s1] sm:$0x1]  ;;  %v321_v4 = vld [vmem:[%s1921_s11 + $0x8] sm:$0xf] }
  0x4e   : > { %1414 = vmatprep.mubr.msk.bf16.mxu0 %vm1728_vm0, %v1727_v0  ;;  %1420 = vmatprep.mubr.msk.bf16.mxu1 %vm1728_vm0, %v1727_v0  ;;  %v322_v5 = vld [vmem:[%s1921_s11 + $0xc] sm:$0xf]  ;;  %v323_v6 = vld [vmem:[%s1921_s11 + $0x10] sm:$0xf]  ;;  %v324_v7 = vld [vmem:[%s1921_s11 + $0x14] sm:$0xf] }
  0x4f   : > { %1413 = vmatpush3.bf16.xpose.msra.mxu0 %v319_v1  ;;  %1419 = vmatpush3.bf16.xpose.msra.mxu1 %v320_v2  ;;  %v325_v8 = vld [vmem:[%s1921_s11 + $0x18] sm:$0xf]  ;;  %v326_v9 = vld [vmem:[%s1921_s11 + $0x1c] sm:$0xf]  ;;  %p305_p12 = scmp.lt.s32.totalorder %s1362_s13, 31  ;;  %vm671_vm1 = vcmask 57344  }
  0x50   : > { %1424 = vmatprep.subr.bf16.mxu0 %v1727_v0  ;;  %1430 = vmatprep.subr.bf16.mxu1 %v1727_v0  ;;  %vm820_vm10 = vcmask 1043456   ;;  %vm816_vm12 = vcmask 64512   ;;  %s1361_s14 = sshll.u32 %s1917_s16, 3  ;;  %s1379_s11 = sshll.u32 %s1783_s22, 7 }
  0x51   : > { %s2256_s13 = smov (!%p305_p12, %s1362_s13), 31  ;;  %s2173_s8 = scalar_lea.vmem [#allocation7], %s1361_s14 }
  0x52   : > { %s1982_s7 = scalar_lea.vmem %s2232_s0, %s2256_s13  ;;  %s2111_s23 = scalar_lea.vmem %s2237_s5, %s2256_s13 }
  0x53   : > { %v327_v10 = vld [vmem:[%s1982_s7] sm:$0x1]  ;;  %v328_v11 = vld [vmem:[%s1982_s7 + $0x1] sm:$0x1]  ;;  %v329_v25 = vld [vmem:[%s1982_s7 + $0x2] sm:$0x1]  ;;  %s2189_s29 = scalar_lea.hbm %s2236_s4, %s1379_s11 }
  0x54   : > { %v330_v26 = vld [vmem:[%s1982_s7 + $0x3] sm:$0x1]  ;;  %v331_v41 = vld [vmem:[%s1982_s7 + $0x4] sm:$0x1]  ;;  %v332_v42 = vld [vmem:[%s1982_s7 + $0x5] sm:$0x1] }
  0x55   : > { %v333_v58 = vld [vmem:[%s1982_s7 + $0x6] sm:$0x1]  ;;  %v334_v59 = vld [vmem:[%s1982_s7 + $0x7] sm:$0x1]  ;;  %s1220_s10 = sshll.u32 %s2173_s8, 4  ;;  %s1203_s22 = scalar_lea.sflag [#allocation4], %s1917_s16  ;;  %s2183_s10 = int_to_ptr.vmem [resolvable:$true] %s1220_s10 }
  0x56   : > { %1415 = vmatmul.mubr.bf16.vlgmr.msra.gmra.mxu0 %v318_v3  ;;  %1421 = vmatmul.mubr.bf16.vlgmr.msra.gmra.mxu1 %v318_v3  ;;  %s1653_s28 = scalar_lea.vmem %s2183_s10, 128  ;;  %p2249_p2 = scmp.ne.s32.totalorder %s2243_s30, 0 }
  0x57   : > { %1425 = vmatpush3.bf16.xpose.msra.mxu0 %v321_v4  ;;  %1431 = vmatpush3.bf16.xpose.msra.mxu1 %v322_v5  ;;  %p1654_p0 = scmp.ne.s32.totalorder %s2183_s10, %s1653_s28  ;;  %s1729_s13 = smov [#allocation7]  }
  0x58   : > { %1426 = vmatprep.mubr.msk.bf16.mxu0 %vm1728_vm0, %v1727_v0  ;;  %1432 = vmatprep.mubr.msk.bf16.mxu1 %vm1728_vm0, %v1727_v0  ;;  %s1657_s25 = sshll.u32 %s1729_s13, 4  ;;  %s1658_s25 = int_to_ptr.vmem [resolvable:$false] %s1657_s25 }
  0x59   : > { %1436 = vmatprep.subr.bf16.mxu0 %v1727_v0  ;;  %1442 = vmatprep.subr.bf16.mxu1 %v1727_v0  ;;  %p1655_p7 = pnand %p1654_p0, %p2249_p2  ;;  %s1659_s12 = scalar_lea.vmem %s1658_s25, 256 }
  0x5a   : > { %p1660_p13 = scmp.lt.s32.totalorder %s2183_s10, %s1658_s25  ;;  %p1661_p1 = scmp.lt.s32.totalorder %s1659_s12, %s1653_s28 }
  0x5b   : > { %p1656_p9 = pneg %p1655_p7 }
  0x5c   : > { %p1662_p3 = por %p1661_p1, %p1660_p13 }
  0x5e   : > { %1427 = vmatmul.mubr.bf16.vlgmr.msra.gmra.mxu0 %v318_v3  ;;  %1433 = vmatmul.mubr.bf16.vlgmr.msra.gmra.mxu1 %v318_v3  ;;  %p1663_p10 = pnand %p1662_p3, %p1656_p9 }
  0x5f   : > { %1437 = vmatpush3.bf16.xpose.msra.mxu0 %v323_v6  ;;  %1443 = vmatpush3.bf16.xpose.msra.mxu1 %v324_v7 }
  0x60   : > { %1438 = vmatprep.mubr.msk.bf16.mxu0 %vm1728_vm0, %v1727_v0  ;;  %1444 = vmatprep.mubr.msk.bf16.mxu1 %vm1728_vm0, %v1727_v0 }
  0x61   : > { %1448 = vmatprep.subr.bf16.mxu0 %v1727_v0  ;;  %1454 = vmatprep.subr.bf16.mxu1 %v1727_v0 }
  0x66   : > { %1439 = vmatmul.mubr.bf16.vlgmr.msra.gmra.mxu0 %v318_v3  ;;  %1445 = vmatmul.mubr.bf16.vlgmr.msra.gmra.mxu1 %v318_v3 }
  0x67   : > { %1449 = vmatpush3.bf16.xpose.msra.mxu0 %v325_v8  ;;  %1455 = vmatpush3.bf16.xpose.msra.mxu1 %v326_v9 }
  0x68   : > { %1450 = vmatprep.mubr.msk.bf16.mxu0 %vm1728_vm0, %v1727_v0  ;;  %1456 = vmatprep.mubr.msk.bf16.mxu1 %vm1728_vm0, %v1727_v0 }
  0x69   : > { %1460 = vmatprep.subr.bf16.mxu0 %v1727_v0  ;;  %1466 = vmatprep.subr.bf16.mxu1 %v1727_v0 }
  0x6e   : > { %1451 = vmatmul.mubr.bf16.vlgmr.msra.gmra.mxu0 %v318_v3  ;;  %1457 = vmatmul.mubr.bf16.vlgmr.msra.gmra.mxu1 %v318_v3 }
  0x6f   : > { %1462 = vmatprep.mubr.msk.bf16.mxu0 %vm1728_vm0, %v1727_v0  ;;  %1468 = vmatprep.mubr.msk.bf16.mxu1 %vm1728_vm0, %v1727_v0 }
 0x116   : > { %v369_v12 = vpop.f32.mrf.mxu0  ;;  %v409_v13 = vpop.f32.mrf.mxu1 }
 0x117   : > { %v1986_v14 = vadd.f32 %v369_v12, %v327_v10  ;;  %v1988_v15 = vadd.f32 %v409_v13, %v328_v11 }
 0x118   : > { %v1416_v16 = vpop.f32.mrf.mxu0  ;;  %v1422_v17 = vpop.f32.mrf.mxu1 }
 0x119   : > { %vm655_vm2 = vcmp.ne.f32.partialorder %v1986_v14, 0.0  ;;  %vm656_vm3 = vcmp.ne.f32.partialorder %v1988_v15, 0.0 }
 0x11a   : > { %v372_v18 = vpop.f32.mrf.mxu0  ;;  %v412_v19 = vpop.f32.mrf.mxu1  ;;  %v1995_v20 = vsel %vm655_vm2, %v1986_v14, -1e+30  ;;  %v2000_v21 = vsel %vm656_vm3, %v1988_v15, -1e+30 }
 0x11b   : > { %v672_v22 = vsel %vm671_vm1, %v1995_v20, -inf  ;;  %v675_v27 = vsel %vm671_vm1, %v2000_v21, -inf }
 0x11c   : > { %v1423_v23 = vpop.f32.mrf.mxu1  ;;  %673 = vmax.xlane.f32.xlu0 %v672_v22  ;;  %v1417_v24 = vpop.f32.mrf.mxu0 }
 0x11e   : > { %v449_v28 = vpop.f32.mrf.mxu0  ;;  %v489_v29 = vpop.f32.mrf.mxu1 }
 0x11f   : > { %v2008_v30 = vadd.f32 %v449_v28, %v329_v25  ;;  %v2010_v31 = vadd.f32 %v489_v29, %v330_v26 }
 0x120   : > { %v1434_v32 = vpop.f32.mrf.mxu1  ;;  %676 = vmax.xlane.f32.xlu0 %v675_v27  ;;  %v1428_v33 = vpop.f32.mrf.mxu0 }
 0x121   : > { %vm657_vm4 = vcmp.ne.f32.partialorder %v2008_v30, 0.0  ;;  %vm658_vm5 = vcmp.ne.f32.partialorder %v2010_v31, 0.0 }
 0x122   : > { %v452_v34 = vpop.f32.mrf.mxu0  ;;  %v492_v35 = vpop.f32.mrf.mxu1  ;;  %v665_v36 = vsel %vm657_vm4, %v2008_v30, -1e+30  ;;  %v666_v37 = vsel %vm658_vm5, %v2010_v31, -1e+30 }
 0x123   : > { %v678_v38 = vsel %vm671_vm1, %v665_v36, -inf  ;;  %v681_v43 = vsel %vm671_vm1, %v666_v37, -inf }
 0x124   : > { %v1435_v39 = vpop.f32.mrf.mxu1  ;;  %679 = vmax.xlane.f32.xlu1 %v678_v38  ;;  %v1429_v40 = vpop.f32.mrf.mxu0 }
 0x126   : > { %v529_v44 = vpop.f32.mrf.mxu0  ;;  %v569_v45 = vpop.f32.mrf.mxu1 }
 0x127   : > { %v2024_v46 = vadd.f32 %v529_v44, %v331_v41  ;;  %v2026_v47 = vadd.f32 %v569_v45, %v332_v42 }
 0x128   : > { %v1446_v48 = vpop.f32.mrf.mxu1  ;;  %682 = vmax.xlane.f32.xlu1 %v681_v43  ;;  %v1440_v49 = vpop.f32.mrf.mxu0 }
 0x129   : > { %vm660_vm6 = vcmp.ne.f32.partialorder %v2026_v47, 0.0  ;;  %vm659_vm7 = vcmp.ne.f32.partialorder %v2024_v46, 0.0 }
 0x12a   : > { %v532_v50 = vpop.f32.mrf.mxu0  ;;  %v572_v51 = vpop.f32.mrf.mxu1  ;;  %v668_v52 = vsel %vm660_vm6, %v2026_v47, -1e+30  ;;  %v667_v53 = vsel %vm659_vm7, %v2024_v46, -1e+30 }
 0x12b   : > { %v687_v54 = vsel %vm671_vm1, %v668_v52, -inf  ;;  %v684_v55 = vsel %vm671_vm1, %v667_v53, -inf }
 0x12c   : > { %v1447_v56 = vpop.f32.mrf.mxu1  ;;  %688 = vmax.xlane.f32.xlu1 %v687_v54  ;;  %685 = vmax.xlane.f32.xlu0 %v684_v55  ;;  %v1441_v57 = vpop.f32.mrf.mxu0 }
 0x12e   : > { %v609_v60 = vpop.f32.mrf.mxu0  ;;  %v649_v61 = vpop.f32.mrf.mxu1 }
 0x12f   : > { %v2040_v62 = vadd.f32 %v609_v60, %v333_v58  ;;  %v2042_v63 = vadd.f32 %v649_v61, %v334_v59  ;;  %v800_v59 = vld [vmem:[%s1928_s26] sm:$0xf]  ;;  %v801_v61 = vld [vmem:[%s1928_s26 + $0x4] sm:$0xf] }
 0x130   : > { %v1452_v1 = vpop.f32.mrf.mxu0  ;;  %v1458_v2 = vpop.f32.mrf.mxu1  ;;  %v822_v60 = vsel %vm820_vm10, %v800_v59, 0 }
 0x131   : > { %vm662_vm8 = vcmp.ne.f32.partialorder %v2042_v63, 0.0  ;;  %vm661_vm9 = vcmp.ne.f32.partialorder %v2040_v62, 0.0  ;;  %1461 = vmatpush3.bf16.msra.mxu0 %v822_v60 }
 0x132   : > { %v612_v3 = vpop.f32.mrf.mxu0  ;;  %v652_v4 = vpop.f32.mrf.mxu1  ;;  %v670_v5 = vsel %vm662_vm8, %v2042_v63, -1e+30  ;;  %v669_v6 = vsel %vm661_vm9, %v2040_v62, -1e+30  ;;  %1472 = vmatprep.subr.bf16.mxu0 %v1727_v0  ;;  %v868_v63 = vsel %vm820_vm10, %v801_v61, 0 }
 0x133   : > { %v693_v7 = vsel %vm671_vm1, %v670_v5, -inf  ;;  %v690_v8 = vsel %vm671_vm1, %v669_v6, -inf  ;;  %1467 = vmatpush3.bf16.msra.mxu1 %v868_v63 }
 0x134   : > { %v1459_v9 = vpop.f32.mrf.mxu1  ;;  %694 = vmax.xlane.f32.xlu1 %v693_v7  ;;  %691 = vmax.xlane.f32.xlu0 %v690_v8  ;;  %v1453_v10 = vpop.f32.mrf.mxu0 }
 0x135   : > { %1478 = vmatprep.subr.bf16.mxu1 %v1727_v0 }
 0x1a5   : > { %v674_v11 = vpop.xlane.xlu0 %673 }
 0x1a6   : > { %v696_v12 = vsub.f32 %v1995_v20, %v674_v11 }
 0x1a8   : > { %v704_v13 = vmul.f32 1.442695, %v696_v12 }
 0x1a9   : > { %v677_v16 = vpop.xlane.xlu0 %676 }
 0x1aa   : > { %1565 = vpow2.f32 %v704_v13  ;;  %v697_v17 = vsub.f32 %v2000_v21, %v677_v16  ;;  %v803_v16 = vld [vmem:[%s1928_s26 + $0xc] sm:$0xf] }
 0x1ac   : > { %v706_v18 = vmul.f32 1.442695, %v697_v17 }
 0x1ad   : > { %v680_v19 = vpop.xlane.xlu1 %679 }
 0x1ae   : > { %1567 = vpow2.f32 %v706_v18  ;;  %v698_v22 = vsub.f32 %v665_v36, %v680_v19 }
 0x1b0   : > { %v708_v23 = vmul.f32 1.442695, %v698_v22  ;;  %v960_v22 = vsel %vm820_vm10, %v803_v16, 0 }
 0x1b1   : > { %v683_v24 = vpop.xlane.xlu1 %682 }
 0x1b2   : > { %1569 = vpow2.f32 %v708_v23  ;;  %v699_v25 = vsub.f32 %v666_v37, %v683_v24  ;;  %v804_v24 = vld [vmem:[%s1928_s26 + $0x10] sm:$0xf] }
 0x1b4   : > { %v710_v26 = vmul.f32 1.442695, %v699_v25 }
 0x1b5   : > { %v689_v27 = vpop.xlane.xlu1 %688  ;;  %v686_v28 = vpop.xlane.xlu0 %685 }
 0x1b6   : > { %1571 = vpow2.f32 %v710_v26  ;;  %v701_v29 = vsub.f32 %v668_v52, %v689_v27  ;;  %v700_v32 = vsub.f32 %v667_v53, %v686_v28 }
 0x1b7   : > { %v1566_v20 = vpop.eup %1565 }
 0x1b8   : > { %v714_v33 = vmul.f32 1.442695, %v701_v29  ;;  %v712_v34 = vmul.f32 1.442695, %v700_v32  ;;  %v720_v21 = vsel %vm655_vm2, %v1566_v20, 0.0  ;;  %v1006_v32 = vsel %vm820_vm10, %v804_v24, 0 }
 0x1b9   : > { %v728_v35 = vsel %vm671_vm1, %v720_v21, 0.0 }
 0x1ba   : > { %1573 = vpow2.f32 %v714_v33  ;;  %729 = vadd.xlane.f32.xlu0 %v728_v35  ;;  %v805_v33 = vld [vmem:[%s1928_s26 + $0x14] sm:$0xf] }
 0x1bb   : > { %v1568_v36 = vpop.eup %1567  ;;  %1575 = vpow2.f32 %v712_v34 }
 0x1bc   : > { %v2061_v37 = vsel %vm656_vm3, %v1568_v36, 0.0  ;;  %v1052_v36 = vsel %vm820_vm10, %v805_v33, 0 }
 0x1bd   : > { %v695_v38 = vpop.xlane.xlu1 %694  ;;  %v692_v39 = vpop.xlane.xlu0 %691  ;;  %v731_v40 = vsel %vm671_vm1, %v2061_v37, 0.0 }
 0x1be   : > { %v703_v41 = vsub.f32 %v670_v5, %v695_v38  ;;  %v702_v42 = vsub.f32 %v669_v6, %v692_v39  ;;  %732 = vadd.xlane.f32.xlu1 %v731_v40  ;;  %v802_v6 = vld [vmem:[%s1928_s26 + $0x8] sm:$0xf]  ;;  %v806_v40 = vld [vmem:[%s1928_s26 + $0x18] sm:$0xf] }
 0x1bf   : > { %v1570_v14 = vpop.eup %1569  ;;  %v914_v12 = vsel %vm820_vm10, %v802_v6, 0 }
 0x1c0   : > { %v718_v43 = vmul.f32 1.442695, %v703_v41  ;;  %v716_v44 = vmul.f32 1.442695, %v702_v42  ;;  %v2067_v45 = vsel %vm657_vm4, %v1570_v14, 0.0 }
 0x1c1   : > { %v734_v15 = vsel %vm671_vm1, %v2067_v45, 0.0 }
 0x1c2   : > { %1577 = vpow2.f32 %v718_v43  ;;  %735 = vadd.xlane.f32.xlu0 %v734_v15  ;;  %v1098_v43 = vsel %vm820_vm10, %v806_v40, 0 }
 0x1c3   : > { %v1572_v48 = vpop.eup %1571  ;;  %1579 = vpow2.f32 %v716_v44  ;;  %v807_v44 = vld [vmem:[%s1928_s26 + $0x1c] sm:$0xf] }
 0x1c4   : > { %v2073_v49 = vsel %vm658_vm5, %v1572_v48, 0.0  ;;  %v1144_v48 = vsel %vm820_vm10, %v807_v44, 0 }
 0x1c5   : > { %v737_v50 = vsel %vm671_vm1, %v2073_v49, 0.0 }
 0x1c6   : > { %738 = vadd.xlane.f32.xlu1 %v737_v50 }
 0x1c7   : > { %v1574_v51 = vpop.eup %1573 }
 0x1c8   : > { %v1576_v30 = vpop.eup %1575  ;;  %v2079_v52 = vsel %vm660_vm6, %v1574_v51, 0.0 }
 0x1c9   : > { %v743_v53 = vsel %vm671_vm1, %v2079_v52, 0.0  ;;  %v2085_v54 = vsel %vm659_vm7, %v1576_v30, 0.0 }
 0x1ca   : > { %744 = vadd.xlane.f32.xlu1 %v743_v53  ;;  %v740_v31 = vsel %vm671_vm1, %v2085_v54, 0.0 }
 0x1cb   : > { %741 = vadd.xlane.f32.xlu0 %v740_v31 }
 0x1cf   : > { %v1578_v55 = vpop.eup %1577 }
 0x1d0   : > { %v1580_v56 = vpop.eup %1579  ;;  %v2091_v47 = vsel %vm662_vm8, %v1578_v55, 0.0 }
 0x1d1   : > { %v749_v57 = vsel %vm671_vm1, %v2091_v47, 0.0  ;;  %v2097_v46 = vsel %vm661_vm9, %v1580_v56, 0.0 }
 0x1d2   : > { %750 = vadd.xlane.f32.xlu1 %v749_v57  ;;  %v746_v58 = vsel %vm671_vm1, %v2097_v46, 0.0 }
 0x1d3   : > { %747 = vadd.xlane.f32.xlu0 %v746_v58 }
 0x243   : > { %v730_v62 = vpop.xlane.xlu0 %729 }
 0x244   : > { %1581 = vrcp.f32 %v730_v62  ;;  %vm760_vm11 = vcmp.gt.f32.partialorder %v730_v62, 0.0 }
 0x247   : > { %v733_v1 = vpop.xlane.xlu1 %732 }
 0x248   : > { %1583 = vrcp.f32 %v733_v1  ;;  %vm761_vm13 = vcmp.gt.f32.partialorder %v733_v1, 0.0 }
 0x24b   : > { %v736_v2 = vpop.xlane.xlu0 %735 }
 0x24c   : > { %1585 = vrcp.f32 %v736_v2  ;;  %vm762_vm14 = vcmp.gt.f32.partialorder %v736_v2, 0.0 }
 0x24f   : > { %v739_v3 = vpop.xlane.xlu1 %738 }
 0x250   : > { %1587 = vrcp.f32 %v739_v3  ;;  %vm763_vm15 = vcmp.gt.f32.partialorder %v739_v3, 0.0 }
 0x251   : > { %v1582_v4 = vpop.eup %1581 }
 0x252   : > { %v768_v5 = vmul.f32 %v1582_v4, %v720_v21 }
 0x253   : > { %v745_v7 = vpop.xlane.xlu1 %744 }
 0x254   : > { %v792_v8 = vsel %vm760_vm11, %v768_v5, 0.0  ;;  %1589 = vrcp.f32 %v745_v7  ;;  %v742_v9 = vpop.xlane.xlu0 %741  ;;  %vm765_vm2 = vcmp.gt.f32.partialorder %v745_v7, 0.0 }
 0x255   : > { %v1584_v10 = vpop.eup %1583  ;;  %v808_v11 = vpack.c.bf16 %v792_v8, %v792_v8  ;;  %1194 = vst.msk [vmem:[%s2111_s23] sm:$0x1] %vm671_vm1, %v792_v8  ;;  %1591 = vrcp.f32 %v742_v9  ;;  %vm764_vm3 = vcmp.gt.f32.partialorder %v742_v9, 0.0 }
 0x256   : > { %v769_v13 = vmul.f32 %v1584_v10, %v2061_v37 }
 0x257   : > { %1463 = vmatmul.mubr.msk.bf16.vlgmr.msra.gmra.mxu0 %vm816_vm12, %v808_v11 }
 0x258   : > { %v793_v17 = vsel %vm761_vm13, %v769_v13, 0.0  ;;  %1473 = vmatpush3.bf16.msra.mxu0 %v914_v12  ;;  %1474 = vmatprep.mubr.msk.bf16.mxu0 %vm1728_vm0, %v1727_v0 }
 0x259   : > { %v1586_v18 = vpop.eup %1585  ;;  %v809_v19 = vpack.c.bf16 %v793_v17, %v793_v17  ;;  %1195 = vst.msk [vmem:[%s2111_s23 + $0x1] sm:$0x1] %vm671_vm1, %v793_v17  ;;  %1484 = vmatprep.subr.bf16.mxu0 %v1727_v0 }
 0x25a   : > { %v770_v23 = vmul.f32 %v1586_v18, %v2067_v45 }
 0x25b   : > { %1469 = vmatmul.mubr.msk.bf16.vlgmr.msra.gmra.mxu1 %vm816_vm12, %v809_v19  ;;  %v751_v25 = vpop.xlane.xlu1 %750 }
 0x25c   : > { %v794_v26 = vsel %vm762_vm14, %v770_v23, 0.0  ;;  %1593 = vrcp.f32 %v751_v25  ;;  %v748_v27 = vpop.xlane.xlu0 %747  ;;  %1479 = vmatpush3.bf16.msra.mxu1 %v960_v22  ;;  %1480 = vmatprep.mubr.msk.bf16.mxu1 %vm1728_vm0, %v1727_v0  ;;  %vm767_vm4 = vcmp.gt.f32.partialorder %v751_v25, 0.0 }
 0x25d   : > { %v1588_v28 = vpop.eup %1587  ;;  %v810_v29 = vpack.c.bf16 %v794_v26, %v794_v26  ;;  %1196 = vst.msk [vmem:[%s2111_s23 + $0x2] sm:$0x1] %vm671_vm1, %v794_v26  ;;  %1595 = vrcp.f32 %v748_v27  ;;  %1490 = vmatprep.subr.bf16.mxu1 %v1727_v0  ;;  %vm766_vm5 = vcmp.gt.f32.partialorder %v748_v27, 0.0 }
 0x25e   : > { %v771_v20 = vmul.f32 %v1588_v28, %v2073_v49 }
 0x25f   : > { %1475 = vmatmul.mubr.msk.bf16.vlgmr.msra.gmra.mxu0 %vm816_vm12, %v810_v29 }
 0x260   : > { %v795_v34 = vsel %vm763_vm15, %v771_v20, 0.0  ;;  %1485 = vmatpush3.bf16.msra.mxu0 %v1006_v32  ;;  %1486 = vmatprep.mubr.msk.bf16.mxu0 %vm1728_vm0, %v1727_v0 }
 0x261   : > { %v1590_v21 = vpop.eup %1589  ;;  %v811_v35 = vpack.c.bf16 %v795_v34, %v795_v34  ;;  %1197 = vst.msk [vmem:[%s2111_s23 + $0x3] sm:$0x1] %vm671_vm1, %v795_v34  ;;  %1496 = vmatprep.subr.bf16.mxu0 %v1727_v0 }
 0x262   : > { %v1592_v37 = vpop.eup %1591  ;;  %v773_v38 = vmul.f32 %v1590_v21, %v2079_v52 }
 0x263   : > { %v772_v39 = vmul.f32 %v1592_v37, %v2085_v54  ;;  %1481 = vmatmul.mubr.msk.bf16.vlgmr.msra.gmra.mxu1 %vm816_vm12, %v811_v35 }
 0x264   : > { %v797_v41 = vsel %vm765_vm2, %v773_v38, 0.0  ;;  %1491 = vmatpush3.bf16.msra.mxu1 %v1052_v36  ;;  %1492 = vmatprep.mubr.msk.bf16.mxu1 %vm1728_vm0, %v1727_v0 }
 0x265   : > { %1199 = vst.msk [vmem:[%s2111_s23 + $0x5] sm:$0x1] %vm671_vm1, %v797_v41  ;;  %v796_v42 = vsel %vm764_vm3, %v772_v39, 0.0  ;;  %1502 = vmatprep.subr.bf16.mxu1 %v1727_v0  ;;  %v813_v15 = vpack.c.bf16 %v797_v41, %v797_v41 }
 0x266   : > { %v812_v14 = vpack.c.bf16 %v796_v42, %v796_v42  ;;  %1198 = vst.msk [vmem:[%s2111_s23 + $0x4] sm:$0x1] %vm671_vm1, %v796_v42 }
 0x268   : > { %1487 = vmatmul.mubr.msk.bf16.vlgmr.msra.gmra.mxu0 %vm816_vm12, %v812_v14 }
 0x269   : > { %v1594_v45 = vpop.eup %1593  ;;  %1497 = vmatpush3.bf16.msra.mxu0 %v1098_v43  ;;  %1498 = vmatprep.mubr.msk.bf16.mxu0 %vm1728_vm0, %v1727_v0 }
 0x26a   : > { %v1596_v49 = vpop.eup %1595  ;;  %v775_v50 = vmul.f32 %v1594_v45, %v2091_v47 }
 0x26b   : > { %v774_v51 = vmul.f32 %v1596_v49, %v2097_v46  ;;  %1493 = vmatmul.mubr.msk.bf16.vlgmr.msra.gmra.mxu1 %vm816_vm12, %v813_v15 }
 0x26c   : > { %v799_v30 = vsel %vm767_vm4, %v775_v50, 0.0  ;;  %1503 = vmatpush3.bf16.msra.mxu1 %v1144_v48  ;;  %1504 = vmatprep.mubr.msk.bf16.mxu1 %vm1728_vm0, %v1727_v0 }
 0x26d   : > { %1201 = vst.msk [vmem:[%s2111_s23 + $0x7] sm:$0x1] %vm671_vm1, %v799_v30  ;;  %v798_v52 = vsel %vm766_vm5, %v774_v51, 0.0  ;;  %v815_v54 = vpack.c.bf16 %v799_v30, %v799_v30 }
 0x26e   : > { %v814_v53 = vpack.c.bf16 %v798_v52, %v798_v52  ;;  %1200 = vst.msk [vmem:[%s2111_s23 + $0x6] sm:$0x1] %vm671_vm1, %v798_v52 }
 0x270   : > { %1499 = vmatmul.mubr.msk.bf16.vlgmr.msra.gmra.mxu0 %vm816_vm12, %v814_v53 }
 0x273   : > { %1505 = vmatmul.mubr.msk.bf16.vlgmr.msra.gmra.mxu1 %vm816_vm12, %v815_v54 }
 0x317   : > { %v858_v31 = vpop.f32.mrf.mxu0 }
 0x318   : > { %1186 = vst [vmem:[%s2173_s8] sm:$0x1] %v858_v31 }
 0x319   : > { %v1464_v0 = vpop.f32.mrf.mxu0 }
 0x31b   : > { %v861_v55 = vpop.f32.mrf.mxu0  ;;  %v904_v56 = vpop.f32.mrf.mxu1 }
 0x31c   : > { %1187 = vst [vmem:[%s2173_s8 + $0x1] sm:$0x1] %v904_v56 }
 0x31d   : > { %v1465_v47 = vpop.f32.mrf.mxu0  ;;  %v1470_v57 = vpop.f32.mrf.mxu1 }
 0x31f   : > { %v907_v46 = vpop.f32.mrf.mxu1  ;;  %v950_v58 = vpop.f32.mrf.mxu0 }
 0x320   : > { %1188 = vst [vmem:[%s2173_s8 + $0x2] sm:$0x1] %v950_v58 }
 0x321   : > { %v1471_v59 = vpop.f32.mrf.mxu1  ;;  %v1476_v60 = vpop.f32.mrf.mxu0 }
 0x323   : > { %v953_v61 = vpop.f32.mrf.mxu0  ;;  %v996_v63 = vpop.f32.mrf.mxu1 }
 0x324   : > { %1189 = vst [vmem:[%s2173_s8 + $0x3] sm:$0x1] %v996_v63 }
 0x325   : > { %v1477_v62 = vpop.f32.mrf.mxu0  ;;  %v1482_v1 = vpop.f32.mrf.mxu1 }
 0x327   : > { %v999_v2 = vpop.f32.mrf.mxu1 }
 0x328   : > { %v1042_v3 = vpop.f32.mrf.mxu0 }
 0x329   : > { %1190 = vst [vmem:[%s2173_s8 + $0x4] sm:$0x1] %v1042_v3  ;;  %v1483_v4 = vpop.f32.mrf.mxu1 }
 0x32a   : > { %v1488_v5 = vpop.f32.mrf.mxu0 }
 0x32b   : > { %v1088_v6 = vpop.f32.mrf.mxu1 }
 0x32c   : > { %v1045_v7 = vpop.f32.mrf.mxu0  ;;  %1191 = vst [vmem:[%s2173_s8 + $0x5] sm:$0x1] %v1088_v6 }
 0x32d   : > { %v1494_v8 = vpop.f32.mrf.mxu1 }
 0x32e   : > { %v1489_v9 = vpop.f32.mrf.mxu0 }
 0x32f   : > { %v1091_v10 = vpop.f32.mrf.mxu1 }
 0x330   : > { %v1134_v11 = vpop.f32.mrf.mxu0 }
 0x331   : > { %1192 = vst [vmem:[%s2173_s8 + $0x6] sm:$0x1] %v1134_v11  ;;  %v1495_v12 = vpop.f32.mrf.mxu1 }
 0x332   : > { %v1500_v13 = vpop.f32.mrf.mxu0 }
 0x333   : > { %v1180_v16 = vpop.f32.mrf.mxu1 }
 0x334   : > { %v1137_v17 = vpop.f32.mrf.mxu0  ;;  %1193 = vst [vmem:[%s2173_s8 + $0x7] sm:$0x1] %v1180_v16 }
 0x335   : > { %v1506_v18 = vpop.f32.mrf.mxu1 }
 0x336   : > { %1666 = shalt.err (!%p1663_p10)
}
 0x337   : > { %s1667_s7 = scalar_lea.hbm %s2189_s29, 128  ;;  %s1671_s23 = scalar_lea.hbm %s2236_s4, 512 }
 0x338   : > { %p1668_p11 = scmp.ne.s32.totalorder %s2189_s29, %s1667_s7  ;;  %p1672_p8 = scmp.lt.s32.totalorder %s2189_s29, %s2236_s4 }
 0x339   : > { %p1673_p6 = scmp.lt.s32.totalorder %s1671_s23, %s1667_s7 }
 0x33a   : > { %p1669_p4 = pnand %p1668_p11, %p2249_p2 }
 0x33b   : > { %p1674_p12 = por %p1673_p6, %p1672_p8 }
 0x33c   : > { %p1670_p5 = pneg %p1669_p4 }
 0x33e   : > { %p1675_p0 = pnand %p1674_p12, %p1670_p5 }
 0x340   : > { %1678 = shalt.err (!%p1675_p0)
}
 0x341   : > { %s1730_s11 = smov 16   ;;  %s1731_s15 = smov 1   ;;  %v1501_v19 = vpop.f32.mrf.mxu0  ;;  %v1183_v22 = vpop.f32.mrf.mxu1 }
 0x342   : > { %1512 = dma.vmem_to_hbm [thread:$0]  (%p2249_p2), %s2183_s10, 128, %s2189_s29, %s1203_s22, %s1730_s11, %s1730_s11, %s1731_s15  }
 0x343   : > { %v1507_v23 = vpop.f32.mrf.mxu1 }
 0x344 PF: > { %p1526_p7 = scmp.ge.s32.totalorder %s1721_s21, 2  ;;  %s1239_s26 = sand.u32 1, %s1709_s18  }
 0x345   : > { %p2250_p9 = scmp.ne.s32.totalorder %s2244_s6, 0  ;;  %s1240_s28 = scalar_lea.sflag [#allocation4], %s1239_s26 }
 0x347   : > { %p1522_p13 = pnand %p1526_p7, %p2250_p9 }
 0x349   : > { %p1523_p1 = pneg %p1522_p13 }
 0x34b   : > { %1704 = dma.done.wait (%p1523_p1), %s1240_s28, 128  }
 0x34c   : > { %1706 = vsyncadd (%p1523_p1), %s1240_s28, 4294967168  ;;  %p22_p2 = scmp.ge.s32.totalorder %s1787_s24, 6   ;;  %s2251_s18 = smov %s1713_s19 }
 0x34d   : > { %s2252_s19 = smov %s1717_s20  ;;  %s2253_s20 = smov %s1799_s27 }
 0x34e   : > { %s2254_s21 = smov %s1787_s24  ;;  %24 = sbr.rel (!%p22_p2) target bundleno = 7 (0x7), region = 109 }
 0x353   :  { %1252 = vsyncpa [#allocation3], 1 }
 0x354   :  { %1254 = vsyncpa [#allocation3 + $0x1], 1 }
 0x355   :  { %1255 = vsyncpa [#allocation6], 1 }
 0x356   :  { %1257 = vsyncpa [#allocation6 + $0x1], 1 }
 0x357   :  { %1258 = vsyncpa [#allocation4], 1 }
 0x358   :  { %1260 = vsyncpa [#allocation4 + $0x1], 1 }

</bundles_post_ra>
